<compile_context>
chip_gen: v5e
topology: v5e:2x2
jax: 0.10.0
libtpu: 0.0.40
codegen_flags: <defaults>
</compile_context>

<pallas_src>
import jax
import jax.numpy as jnp
from jax.experimental import pallas as pl
from jax.experimental.pallas import tpu as pltpu


def skipgram_kernel(x_ref, w_ref, b_ref, o_ref):
    # x_ref : (TN, D)  bf16  gathered embedding rows for this token tile
    # w_ref : (D, VT)  bf16  pre-transposed linear weight tile (VMEM-resident
    #                        across the inner token sweep)
    # b_ref : (1, VT)  f32   bias tile (also resident)
    # o_ref : (TN, VT) bf16  logits tile (lane-dense, unmasked stores)
    acc = jnp.dot(x_ref[...], w_ref[...], preferred_element_type=jnp.float32)
    o_ref[...] = (acc + b_ref[...]).astype(o_ref.dtype)


def _round_up(x, m):
    return ((x + m - 1) // m) * m


def prepare_skipgram_params(emb_table, lin_w, lin_b, *, vt_max=4096):
    """One-time per-model prep: bf16 casts, weight transpose, vocab padding.

    emb_table: (V, D) f32, lin_w: (V, D) f32 (PyTorch nn.Linear layout),
    lin_b: (V,) f32.
    """
    V, D = emb_table.shape
    VT = min(vt_max, _round_up(V, 128))
    V_pad = _round_up(V, VT)

    emb_bf16 = emb_table.astype(jnp.bfloat16)           # (V, D) gather table
    w_t = lin_w.astype(jnp.bfloat16).T                   # (D, V) canonical rhs
    b = lin_b.astype(jnp.float32)
    if V_pad != V:
        w_t = jnp.pad(w_t, ((0, 0), (0, V_pad - V)))
        b = jnp.pad(b, (0, V_pad - V))
    bias2d = b.reshape(1, V_pad)

    return {
        "emb": emb_bf16, "w_t": w_t, "bias": bias2d,
        "V": V, "V_pad": V_pad, "VT": VT, "D": D,
    }


def skipgram_forward(ids, params, *, tn_max=512, out_dtype=jnp.bfloat16):
    """ids: int array of any shape. Returns logits of shape ids.shape + (V,)."""
    orig_shape = ids.shape
    flat = ids.reshape(-1).astype(jnp.int32)
    N = flat.shape[0]

    V, V_pad, VT, D = params["V"], params["V_pad"], params["VT"], params["D"]

    # Embedding gather (XLA gather) from the pre-cast bf16 table.
    x = params["emb"][flat]                              # (N, D) bf16

    # Token tile: multiple of 256 when the batch is big enough (fills the MXU
    # M dim and maximizes tokens-per-weight-residency); else round_up(N, 8).
    if N >= 256:
        TN = min(tn_max, _round_up(N, 256))
    else:
        TN = _round_up(N, 8)
    N_pad = _round_up(N, TN)
    if N_pad != N:
        x = jnp.pad(x, ((0, N_pad - N), (0, 0)))

    # Vocab axis leading so (a) the weight/bias tiles stay resident across the
    # inner token sweep and (b) a megacore split lands on the vocab axis.
    grid = (V_pad // VT, N_pad // TN)

    out = pl.pallas_call(
        skipgram_kernel,
        out_shape=jax.ShapeDtypeStruct((N_pad, V_pad), out_dtype),
        grid_spec=pl.GridSpec(
            grid=grid,
            in_specs=[
                pl.BlockSpec((TN, D), lambda j, i: (i, 0)),   # activations (restreamed)
                pl.BlockSpec((D, VT), lambda j, i: (0, j)),   # weight (resident over i)
                pl.BlockSpec((1, VT), lambda j, i: (0, j)),   # bias   (resident over i)
            ],
            out_specs=pl.BlockSpec((TN, VT), lambda j, i: (i, j)),
        ),
        compiler_params=pltpu.CompilerParams(
            dimension_semantics=("parallel", "arbitrary"),
            vmem_limit_bytes=64 * 1024 * 1024,
        ),
    )(x, params["w_t"], params["bias"])

    out = out[:N, :V]
    return out.reshape(orig_shape + (V,))


if __name__ == "__main__":
    vocab_size = 256
    embedding_dim = 128
    batch, seq = 2, 8

    key = jax.random.PRNGKey(0)
    k_emb, k_w, k_b, k_ids = jax.random.split(key, 4)

    # Deterministic parameter init (shapes per nn.Embedding / nn.Linear):
    #   embedding weight ~ N(0, 1); linear weight/bias ~ U(-1/sqrt(D), 1/sqrt(D))
    emb_table = jax.random.normal(k_emb, (vocab_size, embedding_dim), jnp.float32)
    bound = 1.0 / (embedding_dim ** 0.5)
    lin_w = jax.random.uniform(k_w, (vocab_size, embedding_dim), jnp.float32,
                               minval=-bound, maxval=bound)
    lin_b = jax.random.uniform(k_b, (vocab_size,), jnp.float32,
                               minval=-bound, maxval=bound)

    ids = jax.random.randint(k_ids, (batch, seq), 0, vocab_size, dtype=jnp.int32)

    # One-time prep (bf16 casts, weight transpose, vocab padding), then forward.
    params = prepare_skipgram_params(emb_table, lin_w, lin_b)
    logits = skipgram_forward(ids, params)
    logits = jax.block_until_ready(logits)

    assert logits.shape == (batch, seq, vocab_size)
    logits_f32 = logits.astype(jnp.float32)

    # Matched-precision reference: bf16 inputs, f32 accumulation, bf16 output.
    x_bf = emb_table[ids].astype(jnp.bfloat16).astype(jnp.float32)
    w_bf = lin_w.astype(jnp.bfloat16).astype(jnp.float32)
    ref_bf = (jnp.einsum("bsd,vd->bsv", x_bf, w_bf) + lin_b).astype(jnp.bfloat16)
    assert jnp.allclose(logits_f32, ref_bf.astype(jnp.float32), atol=2e-2, rtol=2e-2)

    # Full-precision PyTorch-semantics reference (loose check covering the
    # bf16 input/output rounding).
    ref_f32 = emb_table[ids] @ lin_w.T + lin_b
    assert jnp.allclose(logits_f32, ref_f32, atol=5e-2, rtol=5e-2)

    print("KERNEL_OK")
</pallas_src>

<mosaic_0001>
module attributes {stable_mosaic.version = 11 : i64} {
  func.func @skipgram_kernel(%arg0: i32, %arg1: i32, %arg2: memref<16x128xbf16, #tpu.memory_space<vmem>>, %arg3: memref<128x256xbf16, #tpu.memory_space<vmem>>, %arg4: memref<1x256xf32, #tpu.memory_space<vmem>>, %arg5: memref<16x256xbf16, #tpu.memory_space<vmem>>) attributes {dimension_semantics = [#tpu.dimension_semantics<parallel>, #tpu.dimension_semantics<arbitrary>], iteration_bounds = array<i64: 1, 1>, scalar_prefetch = 0 : i64, scratch_operands = 0 : i64, tpu.core_type = #tpu.core_type<tc>, window_params = [{transform_indices = @transform_0, window_bounds = array<i64: 16, 128>}, {transform_indices = @transform_1, window_bounds = array<i64: 128, 256>}, {transform_indices = @transform_2, window_bounds = array<i64: 1, 256>}, {transform_indices = @transform_3, window_bounds = array<i64: 16, 256>}]} {
    %c0 = arith.constant 0 : index
    %c0_0 = arith.constant 0 : index
    %0 = vector.load %arg2[%c0, %c0_0] : memref<16x128xbf16, #tpu.memory_space<vmem>>, vector<16x128xbf16>
    %c0_1 = arith.constant 0 : index
    %c0_2 = arith.constant 0 : index
    %1 = vector.load %arg3[%c0_1, %c0_2] : memref<128x256xbf16, #tpu.memory_space<vmem>>, vector<128x256xbf16>
    %cst = arith.constant dense<0.000000e+00> : vector<16x256xf32>
    %2 = tpu.matmul %0, %1, %cst {dimension_numbers = #tpu.dot_dimension_numbers<[1], [0], [0], [1], [0, 0, 1, 1], [], []>} : vector<16x128xbf16>, vector<128x256xbf16>, vector<16x256xf32> -> vector<16x256xf32>
    %c0_3 = arith.constant 0 : index
    %c0_4 = arith.constant 0 : index
    %3 = vector.load %arg4[%c0_3, %c0_4] : memref<1x256xf32, #tpu.memory_space<vmem>>, vector<1x256xf32>
    %4 = vector.broadcast %3 : vector<1x256xf32> to vector<16x256xf32>
    %5 = arith.addf %2, %4 : vector<16x256xf32>
    %6 = arith.truncf %5 : vector<16x256xf32> to vector<16x256xbf16>
    %c0_5 = arith.constant 0 : index
    %c0_6 = arith.constant 0 : index
    %7 = vector.load %arg5[%c0_5, %c0_6] : memref<16x256xbf16, #tpu.memory_space<vmem>>, vector<16x256xbf16>
    tpu.vector_store %arg5[%c0_5, %c0_6], %6 {strides = array<i32>} : memref<16x256xbf16, #tpu.memory_space<vmem>>, vector<16x256xbf16>,
    return
  }
  func.func @transform_0(%arg0: i32, %arg1: i32) -> (i32, i32) {
    %c0_i32 = arith.constant 0 : i32
    %c0_i32_0 = arith.constant 0 : i32
    return %arg1, %c0_i32 : i32, i32
  }
  func.func @transform_1(%arg0: i32, %arg1: i32) -> (i32, i32) {
    %c0_i32 = arith.constant 0 : i32
    %c0_i32_0 = arith.constant 0 : i32
    return %c0_i32, %arg0 : i32, i32
  }
  func.func @transform_2(%arg0: i32, %arg1: i32) -> (i32, i32) {
    %c0_i32 = arith.constant 0 : i32
    %c0_i32_0 = arith.constant 0 : i32
    return %c0_i32, %arg0 : i32, i32
  }
  func.func @transform_3(%arg0: i32, %arg1: i32) -> (i32, i32) {
    %c0_i32 = arith.constant 0 : i32
    return %arg1, %arg0 : i32, i32
  }
}

</mosaic_0001>

<bundles_post_ra>
// kernel: tpu_custom_call.1
= control target key start
LH: loop header
LB: loop body
LE: loop exit
PB: predicated region body
PF: predicated region fallthrough
CT: control target
= control target key end

     0   :  { %8 = vsyncpa [#allocation3], 0  ;;  %s463_s0 = inlined_call_operand.hbm [shape: bf16[16,128], index: 0, kind: input, shape index: {}]   ;;  %s464_s1 = inlined_call_operand.hbm [shape: bf16[128,256], index: 1, kind: input, shape index: {}]   ;;  %s465_s2 = inlined_call_operand.hbm [shape: f32[1,256], index: 2, kind: input, shape index: {}]   ;;  %s466_s3 = inlined_call_operand.hbm [shape: bf16[16,256], index: 3, kind: output, shape index: {}]  }
   0x1   :  { %9 = vsyncpa [#allocation6], 0  ;;  %s28_s14 = sshll.u32 %s464_s1, 4  ;;  %s29_s14 = int_to_ptr.hbm [resolvable:$true] %s28_s14 }
   0x2   :  { %10 = vsyncpa [#allocation4], 0  ;;  %s417_s15 = smov [#allocation5]   ;;  %s15_s19 = sshll.u32 %s463_s0, 4  ;;  %s16_s19 = int_to_ptr.hbm [resolvable:$true] %s15_s19 }
   0x3   :  { %s30_s16 = sshll.u32 %s417_s15, 4  ;;  %s418_s20 = smov 128   ;;  %s31_s16 = int_to_ptr.vmem [resolvable:$true] %s30_s16 }
   0x4   :  { %s419_s21 = smov 8   ;;  %s420_s22 = smov [#allocation2]  }
   0x5   :  { %36 = dma.hbm_to_vmem [thread:$0]  %s29_s14, 2048, %s31_s16, [#allocation6], %s418_s20, %s418_s20, %s419_s21  }
   0x6   :  { %s17_s23 = sshll.u32 %s420_s22, 4  ;;  %s421_s1 = smov 64   ;;  %s18_s23 = int_to_ptr.vmem [resolvable:$true] %s17_s23 }
   0x7   :  { %s422_s24 = smov 4   ;;  %s42_s27 = sshll.u32 %s465_s2, 4  ;;  %s43_s27 = int_to_ptr.hbm [resolvable:$true] %s42_s27 }
   0x8   :  { %23 = dma.hbm_to_vmem [thread:$0]  %s16_s19, 128, %s18_s23, [#allocation3], %s421_s1, %s421_s1, %s422_s24  }
   0x9   :  { %s423_s28 = smov [#allocation7]  }
   0xa   :  { %s44_s0 = sshll.u32 %s423_s28, 4  ;;  %s45_s0 = int_to_ptr.vmem [resolvable:$true] %s44_s0 }
   0xb   :  { %47 = dma.hbm_to_vmem [thread:$0]  %s43_s27, 32, %s45_s0, [#allocation6]  }
   0xc   :  { %411 = dma.done.wait [#allocation3], 128  }
   0xd   :  { %412 = vsyncadd [#allocation3], 4294967168 }
   0xe   :  { %413 = dma.done.wait [#allocation6], 2080  }
   0xf   :  { %414 = vsyncadd [#allocation6], 4294965216  ;;  %v284_v0 = vld [vmem:[#allocation5 + $0x70] sm:$0xf]  ;;  %v306_v1 = vld [vmem:[#allocation5 + $0x74] sm:$0xf0] }
  0x10   :  { %v305_v2 = vld [vmem:[#allocation5 + $0x74] sm:$0xf]  ;;  %v285_v3 = vor.u32 %v306_v1, %v284_v0  ;;  %v286_v4 = vld [vmem:[#allocation5 + $0x78] sm:$0xf0]  ;;  %v276_v5 = vld [vmem:[#allocation5 + $0x60] sm:$0xf] }
  0x11   :  { %v304_v6 = vld [vmem:[#allocation5 + $0x64] sm:$0xf0]  ;;  %v289_v7 = vor.u32 %v305_v2, %v286_v4  ;;  %v303_v8 = vld [vmem:[#allocation5 + $0x64] sm:$0xf]  ;;  %v278_v9 = vld [vmem:[#allocation5 + $0x68] sm:$0xf0] }
  0x12   :  { %170 = vmatpush.bf16.msra.mxu0 %v285_v3  ;;  %v277_v10 = vor.u32 %v304_v6, %v276_v5  ;;  %v281_v11 = vor.u32 %v303_v8, %v278_v9  ;;  %v268_v12 = vld [vmem:[#allocation5 + $0x50] sm:$0xf]  ;;  %v302_v13 = vld [vmem:[#allocation5 + $0x54] sm:$0xf0]  ;;  %v301_v14 = vld [vmem:[#allocation5 + $0x54] sm:$0xf] }
  0x13   :  { %184 = vmatpush.bf16.msra.mxu1 %v289_v7  ;;  %v270_v15 = vld [vmem:[#allocation5 + $0x58] sm:$0xf0]  ;;  %v269_v16 = vor.u32 %v302_v13, %v268_v12  ;;  %v260_v18 = vld [vmem:[#allocation5 + $0x40] sm:$0xf]  ;;  %v300_v19 = vld [vmem:[#allocation5 + $0x44] sm:$0xf0] }
  0x14   :  { %v273_v17 = vor.u32 %v301_v14, %v270_v15  ;;  %v299_v20 = vld [vmem:[#allocation5 + $0x44] sm:$0xf]  ;;  %v262_v21 = vld [vmem:[#allocation5 + $0x48] sm:$0xf0]  ;;  %v261_v22 = vor.u32 %v300_v19, %v260_v18  ;;  %v252_v24 = vld [vmem:[#allocation5 + $0x30] sm:$0xf] }
  0x15   :  { %v265_v23 = vor.u32 %v299_v20, %v262_v21  ;;  %v298_v25 = vld [vmem:[#allocation5 + $0x34] sm:$0xf0]  ;;  %v297_v26 = vld [vmem:[#allocation5 + $0x34] sm:$0xf]  ;;  %v254_v27 = vld [vmem:[#allocation5 + $0x38] sm:$0xf0] }
  0x16   :  { %171 = vmatpush.bf16.msra.mxu0 %v277_v10  ;;  %v253_v28 = vor.u32 %v298_v25, %v252_v24  ;;  %v257_v29 = vor.u32 %v297_v26, %v254_v27  ;;  %v244_v30 = vld [vmem:[#allocation5 + $0x20] sm:$0xf]  ;;  %v296_v31 = vld [vmem:[#allocation5 + $0x24] sm:$0xf0]  ;;  %v295_v32 = vld [vmem:[#allocation5 + $0x24] sm:$0xf] }
  0x17   :  { %185 = vmatpush.bf16.msra.mxu1 %v281_v11  ;;  %v246_v33 = vld [vmem:[#allocation5 + $0x28] sm:$0xf0]  ;;  %v245_v34 = vor.u32 %v296_v31, %v244_v30  ;;  %v236_v36 = vld [vmem:[#allocation5 + $0x10] sm:$0xf]  ;;  %v294_v37 = vld [vmem:[#allocation5 + $0x14] sm:$0xf0] }
  0x18   :  { %v249_v35 = vor.u32 %v295_v32, %v246_v33  ;;  %v293_v38 = vld [vmem:[#allocation5 + $0x14] sm:$0xf]  ;;  %v238_v39 = vld [vmem:[#allocation5 + $0x18] sm:$0xf0]  ;;  %v237_v40 = vor.u32 %v294_v37, %v236_v36  ;;  %v228_v42 = vld [vmem:[#allocation5] sm:$0xf] }
  0x19   :  { %v241_v41 = vor.u32 %v293_v38, %v238_v39  ;;  %v292_v43 = vld [vmem:[#allocation5 + $0x4] sm:$0xf0]  ;;  %v291_v44 = vld [vmem:[#allocation5 + $0x4] sm:$0xf]  ;;  %v230_v45 = vld [vmem:[#allocation5 + $0x8] sm:$0xf0] }
  0x1a   :  { %172 = vmatpush.bf16.msra.mxu0 %v269_v16  ;;  %v229_v46 = vor.u32 %v292_v43, %v228_v42  ;;  %v233_v47 = vor.u32 %v291_v44, %v230_v45  ;;  %v290_v48 = vld [vmem:[#allocation2] sm:$0xff]  ;;  %v78_v49 = vld [vmem:[#allocation7] sm:$0x3]  ;;  %s424_s2 = smov [#allocation8]   ;;  %s208_s5 = sshll.u32 %s466_s3, 4  ;;  %s209_s5 = int_to_ptr.hbm [resolvable:$true] %s208_s5 }
  0x1b   :  { %186 = vmatpush.bf16.msra.mxu1 %v273_v17  ;;  %v80_v50 = vperm.slane %v78_v49, 0  ;;  %v81_v51 = vperm.slane %v78_v49, 1  ;;  %s206_s29 = sshll.u32 %s424_s2, 4  ;;  %s207_s29 = int_to_ptr.vmem [resolvable:$true] %s206_s29 }
  0x1e   :  { %173 = vmatpush.bf16.msra.mxu0 %v261_v22 }
  0x1f   :  { %187 = vmatpush.bf16.msra.mxu1 %v265_v23 }
  0x22   :  { %174 = vmatpush.bf16.msra.mxu0 %v253_v28 }
  0x23   :  { %188 = vmatpush.bf16.msra.mxu1 %v257_v29 }
  0x26   :  { %175 = vmatpush.bf16.msra.mxu0 %v245_v34 }
  0x27   :  { %189 = vmatpush.bf16.msra.mxu1 %v249_v35 }
  0x2a   :  { %176 = vmatpush.bf16.msra.mxu0 %v237_v40 }
  0x2b   :  { %190 = vmatpush.bf16.msra.mxu1 %v241_v41 }
  0x2e   :  { %177 = vmatpush.bf16.msra.mxu0 %v229_v46 }
  0x2f   :  { %191 = vmatpush.bf16.msra.mxu1 %v233_v47 }
  0x31   :  { %178 = vmatmul.bf16.vlgmr.msra.gmra.mxu0 %v290_v48 }
  0x32   :  { %192 = vmatmul.bf16.vlgmr.msra.gmra.mxu1 %v290_v48 }
  0xae   :  { %v179_v52 = vpop.f32.mrf.mxu0 }
  0xaf   :  { %v180_v53 = vadd.f32 %v179_v52, %v80_v50  ;;  %v193_v54 = vpop.f32.mrf.mxu1 }
  0xb0   :  { %v194_v55 = vadd.f32 %v193_v54, %v81_v51 }
  0xb2   :  { %v198_v56 = vpack.c.bf16 %v194_v55, %v180_v53 }
  0xb4   :  { %200 = vst [vmem:[#allocation8] sm:$0xff] %v198_v56 }
  0xb6   :  { %v181_v57 = vpop.f32.mrf.mxu0 }
  0xb7   :  { %v182_v58 = vadd.f32 %v181_v57, %v80_v50  ;;  %v195_v59 = vpop.f32.mrf.mxu1 }
  0xb8   :  { %v196_v60 = vadd.f32 %v195_v59, %v81_v51 }
  0xba   :  { %v199_v61 = vpack.c.bf16 %v196_v60, %v182_v58 }
  0xbc   :  { %201 = vst [vmem:[#allocation8 + $0x8] sm:$0xff] %v199_v61 }
  0xbd   :  { %214 = dma.vmem_to_hbm [thread:$0]  %s207_s29, 256, %s209_s5, [#allocation4], %s418_s20, %s418_s20, %s419_s21  }
  0xbe   :  { %415 = dma.done.wait [#allocation4], 256  }
  0xbf   :  { %416 = vsyncadd [#allocation4], 4294967040 }
  0xc0   :  { %219 = vsyncpa [#allocation3], 1 }
  0xc1   :  { %220 = vsyncpa [#allocation6], 1 }
  0xc2   :  { %221 = vsyncpa [#allocation4], 1 }

</bundles_post_ra>
